<compile_context>
chip_gen: v5e
topology: v5e:2x2
jax: 0.10.0
libtpu: 0.0.40
codegen_flags: <defaults>
</compile_context>

<pallas_src>
import jax
import jax.numpy as jnp
from jax import lax
from jax.experimental import pallas as pl
from jax.experimental.pallas import tpu as pltpu

LN_EPS = 1e-5  # PyTorch nn.LayerNorm default eps


def _round_up(n, m):
    return ((n + m - 1) // m) * m


def _mlp_classifier_kernel(x_ref, gamma_ref, beta_ref, w_ref, bias_ref, o_ref):
    """Fused LayerNorm (over last dim) + Linear for one batch tile.

    x_ref:     [TB, D]      input activations (one batch tile)
    gamma_ref: [1, D]       LayerNorm weight      (resident)
    beta_ref:  [1, D]       LayerNorm bias        (resident)
    w_ref:     [C_pad, D]   Linear weight, PyTorch layout (resident)
    bias_ref:  [1, C_pad]   Linear bias           (resident)
    o_ref:     [TB, C_pad]  output logits (lane-dense)
    """
    x = x_ref[...].astype(jnp.float32)
    inv_d = jnp.float32(1.0 / x.shape[-1])

    # One-pass LayerNorm statistics: both reductions issue back-to-back.
    sum_x = jnp.sum(x, axis=-1, keepdims=True)
    sum_x2 = jnp.sum(x * x, axis=-1, keepdims=True)
    mean = sum_x * inv_d
    var = jnp.maximum(sum_x2 * inv_d - mean * mean, 0.0)
    x_norm = (x - mean) * lax.rsqrt(var + LN_EPS)
    x_norm = (x_norm * gamma_ref[...].astype(jnp.float32)
              + beta_ref[...].astype(jnp.float32))

    # Linear: [TB, D] contracted with [C_pad, D] on D -> [TB, C_pad].
    # Feed the MXU in the weight's native dtype; accumulate in f32.
    w = w_ref[...]
    logits = lax.dot_general(
        x_norm.astype(w.dtype), w,
        dimension_numbers=(((1,), (1,)), ((), ())),
        preferred_element_type=jnp.float32)
    logits = logits + bias_ref[...].astype(jnp.float32)

    o_ref[...] = logits.astype(o_ref.dtype)


def mlp_classifier(x, ln_weight, ln_bias, fc_weight, fc_bias, *, block_b=512):
    """Forward of MLPClassifier.

    x: [B, D]; ln_weight/ln_bias: [D]; fc_weight: [C, D] (PyTorch layout);
    fc_bias: [C]. Returns logits [B, C].
    """
    B, D = x.shape
    C = fc_weight.shape[0]

    # Lane-dense output: pad the class dim to a multiple of 128.
    C_pad = _round_up(max(C, 128), 128)
    if C_pad != C:
        w = jnp.pad(fc_weight, ((0, C_pad - C), (0, 0)))
        b = jnp.pad(fc_bias, ((0, C_pad - C),))
    else:
        w, b = fc_weight, fc_bias

    gamma = ln_weight.reshape(1, D)
    beta = ln_bias.reshape(1, D)
    bias = b.reshape(1, C_pad)

    # Batch tiling: pipeline-friendly tile, sublane-aligned, capped at block_b.
    TB = min(block_b, _round_up(B, 8))
    B_pad = _round_up(B, TB)
    x_in = jnp.pad(x, ((0, B_pad - B), (0, 0))) if B_pad != B else x
    grid = (B_pad // TB,)

    itemsize = jnp.dtype(x.dtype).itemsize
    w_itemsize = jnp.dtype(w.dtype).itemsize
    cost = pl.CostEstimate(
        flops=2 * B_pad * D * C_pad + 10 * B_pad * D,
        transcendentals=B_pad,
        bytes_accessed=(B_pad * D * itemsize          # x
                        + C_pad * D * w_itemsize      # W
                        + 2 * D * 4 + C_pad * 4       # gamma, beta, bias
                        + B_pad * C_pad * itemsize),  # out
    )

    out = pl.pallas_call(
        _mlp_classifier_kernel,
        out_shape=jax.ShapeDtypeStruct((B_pad, C_pad), x.dtype),
        grid_spec=pltpu.PrefetchScalarGridSpec(
            num_scalar_prefetch=0,
            grid=grid,
            in_specs=[
                pl.BlockSpec((TB, D), lambda i: (i, 0)),        # x tile (pipelined)
                pl.BlockSpec((1, D), lambda i: (0, 0)),         # gamma (resident)
                pl.BlockSpec((1, D), lambda i: (0, 0)),         # beta  (resident)
                pl.BlockSpec((C_pad, D), lambda i: (0, 0)),     # W     (resident)
                pl.BlockSpec((1, C_pad), lambda i: (0, 0)),     # bias  (resident)
            ],
            out_specs=pl.BlockSpec((TB, C_pad), lambda i: (i, 0)),
        ),
        compiler_params=pltpu.CompilerParams(
            dimension_semantics=("parallel",),
            vmem_limit_bytes=64 * 1024 * 1024,
        ),
        cost_estimate=cost,
    )(x_in, gamma, beta, w, bias)

    return out[:B, :C]


def _reference(x, ln_weight, ln_bias, fc_weight, fc_bias):
    xf = x.astype(jnp.float32)
    mean = jnp.mean(xf, axis=-1, keepdims=True)
    var = jnp.mean((xf - mean) ** 2, axis=-1, keepdims=True)
    xn = (xf - mean) / jnp.sqrt(var + LN_EPS)
    xn = xn * ln_weight + ln_bias
    return xn @ fc_weight.T + fc_bias


if __name__ == "__main__":
    # Small shapes consistent with the module's forward: x [B, D] -> logits [B, C].
    B, D, C = 8, 128, 16  # batch, embedding_dim, num_classes

    key = jax.random.PRNGKey(0)
    kx, kw, kb = jax.random.split(key, 3)

    x = jax.random.normal(kx, (B, D), dtype=jnp.float32)

    # Deterministic parameter init (synthetic; shapes match nn.LayerNorm / nn.Linear).
    ln_weight = jnp.ones((D,), dtype=jnp.float32)     # LayerNorm weight init = 1
    ln_bias = jnp.zeros((D,), dtype=jnp.float32)      # LayerNorm bias init = 0
    bound = 1.0 / jnp.sqrt(jnp.float32(D))
    fc_weight = jax.random.uniform(kw, (C, D), minval=-bound, maxval=bound,
                                   dtype=jnp.float32)
    fc_bias = jax.random.uniform(kb, (C,), minval=-bound, maxval=bound,
                                 dtype=jnp.float32)

    out = mlp_classifier(x, ln_weight, ln_bias, fc_weight, fc_bias)
    out = jax.block_until_ready(out)

    ref = _reference(x, ln_weight, ln_bias, fc_weight, fc_bias)
    assert out.shape == (B, C), out.shape
    assert jnp.allclose(out, ref, atol=1e-4, rtol=1e-4), \
        f"max err {jnp.max(jnp.abs(out - ref))}"

    # TODO(synk): nn.Dropout exists in the module __init__ but is unused in
    # forward(), so it is intentionally not implemented here.

    print("KERNEL_OK")
</pallas_src>

<mosaic_0001>
module attributes {stable_mosaic.version = 11 : i64} {
  func.func @_mlp_classifier_kernel(%arg0: i32, %arg1: memref<8x128xf32, #tpu.memory_space<vmem>>, %arg2: memref<1x128xf32, #tpu.memory_space<vmem>>, %arg3: memref<1x128xf32, #tpu.memory_space<vmem>>, %arg4: memref<128x128xf32, #tpu.memory_space<vmem>>, %arg5: memref<1x128xf32, #tpu.memory_space<vmem>>, %arg6: memref<8x128xf32, #tpu.memory_space<vmem>>) attributes {dimension_semantics = [#tpu.dimension_semantics<parallel>], iteration_bounds = array<i64: 1>, scalar_prefetch = 0 : i64, scratch_operands = 0 : i64, tpu.core_type = #tpu.core_type<tc>, window_params = [{transform_indices = @transform_0, window_bounds = array<i64: 8, 128>}, {pipeline_mode = #tpu.pipeline_mode<synchronous>, transform_indices = @transform_1, window_bounds = array<i64: 1, 128>}, {pipeline_mode = #tpu.pipeline_mode<synchronous>, transform_indices = @transform_2, window_bounds = array<i64: 1, 128>}, {pipeline_mode = #tpu.pipeline_mode<synchronous>, transform_indices = @transform_3, window_bounds = array<i64: 128, 128>}, {pipeline_mode = #tpu.pipeline_mode<synchronous>, transform_indices = @transform_4, window_bounds = array<i64: 1, 128>}, {transform_indices = @transform_5, window_bounds = array<i64: 8, 128>}]} {
    %c0 = arith.constant 0 : index
    %c0_0 = arith.constant 0 : index
    %0 = vector.load %arg1[%c0, %c0_0] : memref<8x128xf32, #tpu.memory_space<vmem>>, vector<8x128xf32>
    %cst = arith.constant dense<0.000000e+00> : vector<8xf32>
    %1 = vector.multi_reduction <add>, %0, %cst [1] : vector<8x128xf32> to vector<8xf32>
    %2 = vector.shape_cast %1 : vector<8xf32> to vector<8x1xf32>
    %3 = arith.mulf %0, %0 : vector<8x128xf32>
    %cst_1 = arith.constant dense<0.000000e+00> : vector<8xf32>
    %4 = vector.multi_reduction <add>, %3, %cst_1 [1] : vector<8x128xf32> to vector<8xf32>
    %5 = vector.shape_cast %4 : vector<8xf32> to vector<8x1xf32>
    %cst_2 = arith.constant 7.812500e-03 : f32
    %6 = vector.broadcast %cst_2 : f32 to vector<8x1xf32>
    %7 = arith.mulf %2, %6 : vector<8x1xf32>
    %cst_3 = arith.constant 7.812500e-03 : f32
    %8 = vector.broadcast %cst_3 : f32 to vector<8x1xf32>
    %9 = arith.mulf %5, %8 : vector<8x1xf32>
    %10 = arith.mulf %7, %7 : vector<8x1xf32>
    %11 = arith.subf %9, %10 : vector<8x1xf32>
    %cst_4 = arith.constant 0.000000e+00 : f32
    %12 = vector.broadcast %cst_4 : f32 to vector<8x1xf32>
    %13 = arith.maximumf %11, %12 : vector<8x1xf32>
    %14 = vector.broadcast %7 : vector<8x1xf32> to vector<8x128xf32>
    %15 = arith.subf %0, %14 : vector<8x128xf32>
    %cst_5 = arith.constant 9.99999974E-6 : f32
    %16 = vector.broadcast %cst_5 : f32 to vector<8x1xf32>
    %17 = arith.addf %13, %16 : vector<8x1xf32>
    %18 = math.rsqrt %17 : vector<8x1xf32>
    %19 = vector.broadcast %18 : vector<8x1xf32> to vector<8x128xf32>
    %20 = arith.mulf %15, %19 : vector<8x128xf32>
    %c0_6 = arith.constant 0 : index
    %c0_7 = arith.constant 0 : index
    %21 = vector.load %arg2[%c0_6, %c0_7] : memref<1x128xf32, #tpu.memory_space<vmem>>, vector<1x128xf32>
    %22 = vector.broadcast %21 : vector<1x128xf32> to vector<8x128xf32>
    %23 = arith.mulf %20, %22 : vector<8x128xf32>
    %c0_8 = arith.constant 0 : index
    %c0_9 = arith.constant 0 : index
    %24 = vector.load %arg3[%c0_8, %c0_9] : memref<1x128xf32, #tpu.memory_space<vmem>>, vector<1x128xf32>
    %25 = vector.broadcast %24 : vector<1x128xf32> to vector<8x128xf32>
    %26 = arith.addf %23, %25 : vector<8x128xf32>
    %c0_10 = arith.constant 0 : index
    %c0_11 = arith.constant 0 : index
    %27 = vector.load %arg4[%c0_10, %c0_11] : memref<128x128xf32, #tpu.memory_space<vmem>>, vector<128x128xf32>
    %cst_12 = arith.constant dense<0.000000e+00> : vector<8x128xf32>
    %28 = tpu.matmul %26, %27, %cst_12 {dimension_numbers = #tpu.dot_dimension_numbers<[1], [1], [0], [0], [0, 0, 1, 0], [], []>} : vector<8x128xf32>, vector<128x128xf32>, vector<8x128xf32> -> vector<8x128xf32>
    %c0_13 = arith.constant 0 : index
    %c0_14 = arith.constant 0 : index
    %29 = vector.load %arg5[%c0_13, %c0_14] : memref<1x128xf32, #tpu.memory_space<vmem>>, vector<1x128xf32>
    %30 = vector.broadcast %29 : vector<1x128xf32> to vector<8x128xf32>
    %31 = arith.addf %28, %30 : vector<8x128xf32>
    %c0_15 = arith.constant 0 : index
    %c0_16 = arith.constant 0 : index
    %32 = vector.load %arg6[%c0_15, %c0_16] : memref<8x128xf32, #tpu.memory_space<vmem>>, vector<8x128xf32>
    tpu.vector_store %arg6[%c0_15, %c0_16], %31 {strides = array<i32>} : memref<8x128xf32, #tpu.memory_space<vmem>>, vector<8x128xf32>,
    return
  }
  func.func @transform_0(%arg0: i32) -> (i32, i32) {
    %c0_i32 = arith.constant 0 : i32
    %c0_i32_0 = arith.constant 0 : i32
    return %arg0, %c0_i32 : i32, i32
  }
  func.func @transform_1(%arg0: i32) -> (i32, i32) {
    %c0_i32 = arith.constant 0 : i32
    %c0_i32_0 = arith.constant 0 : i32
    %c0_i32_1 = arith.constant 0 : i32
    return %c0_i32, %c0_i32_0 : i32, i32
  }
  func.func @transform_2(%arg0: i32) -> (i32, i32) {
    %c0_i32 = arith.constant 0 : i32
    %c0_i32_0 = arith.constant 0 : i32
    %c0_i32_1 = arith.constant 0 : i32
    return %c0_i32, %c0_i32_0 : i32, i32
  }
  func.func @transform_3(%arg0: i32) -> (i32, i32) {
    %c0_i32 = arith.constant 0 : i32
    %c0_i32_0 = arith.constant 0 : i32
    %c0_i32_1 = arith.constant 0 : i32
    return %c0_i32, %c0_i32_0 : i32, i32
  }
  func.func @transform_4(%arg0: i32) -> (i32, i32) {
    %c0_i32 = arith.constant 0 : i32
    %c0_i32_0 = arith.constant 0 : i32
    %c0_i32_1 = arith.constant 0 : i32
    return %c0_i32, %c0_i32_0 : i32, i32
  }
  func.func @transform_5(%arg0: i32) -> (i32, i32) {
    %c0_i32 = arith.constant 0 : i32
    %c0_i32_0 = arith.constant 0 : i32
    return %arg0, %c0_i32 : i32, i32
  }
}

</mosaic_0001>

<bundles_post_ra>
// kernel: tpu_custom_call.1
= control target key start
LH: loop header
LB: loop body
LE: loop exit
PB: predicated region body
PF: predicated region fallthrough
CT: control target
= control target key end

     0   :  { %10 = vsyncpa [#allocation3], 0  ;;  %s324_s0 = inlined_call_operand.hbm [shape: f32[8,128], index: 0, kind: input, shape index: {}]   ;;  %s325_s1 = inlined_call_operand.hbm [shape: f32[1,128], index: 1, kind: input, shape index: {}]   ;;  %s326_s2 = inlined_call_operand.vmem [shape: f32[1,128], index: 2, kind: input, shape index: {}]   ;;  %s327_s3 = inlined_call_operand.hbm [shape: f32[128,128], index: 3, kind: input, shape index: {}]   ;;  %s328_s4 = inlined_call_operand.vmem [shape: f32[1,128], index: 4, kind: input, shape index: {}]   ;;  %s329_s5 = inlined_call_operand.hbm [shape: f32[8,128], index: 5, kind: output, shape index: {}]  }
   0x1   :  { %11 = vsyncpa [#allocation6], 0  ;;  %s29_s20 = sshll.u32 %s325_s1, 4  ;;  %s30_s20 = int_to_ptr.hbm [resolvable:$true] %s29_s20 }
   0x2   :  { %12 = vsyncpa [#allocation4], 0  ;;  %s270_s21 = smov [#allocation5]   ;;  %s18_s25 = sshll.u32 %s324_s0, 4  ;;  %s19_s25 = int_to_ptr.hbm [resolvable:$true] %s18_s25 }
   0x3   :  { %s31_s22 = sshll.u32 %s270_s21, 4  ;;  %s271_s26 = smov [#allocation2]   ;;  %s32_s22 = int_to_ptr.vmem [resolvable:$true] %s31_s22 }
   0x4   :  { %34 = dma.hbm_to_vmem [thread:$0]  %s30_s20, 16, %s32_s22, [#allocation6]  }
   0x5   :  { %s20_s27 = sshll.u32 %s271_s26, 4  ;;  %s41_s30 = sshll.u32 %s327_s3, 4  ;;  %s21_s27 = int_to_ptr.vmem [resolvable:$true] %s20_s27  ;;  %s42_s30 = int_to_ptr.hbm [resolvable:$true] %s41_s30 }
   0x6   :  { %23 = dma.hbm_to_vmem [thread:$0]  %s19_s25, 128, %s21_s27, [#allocation3]  }
   0x7   :  { %s272_s1 = smov [#allocation7]   ;;  %s273_s7 = smov 128  }
   0x8   :  { %s43_s6 = sshll.u32 %s272_s1, 4  ;;  %s274_s8 = smov 8   ;;  %s44_s6 = int_to_ptr.vmem [resolvable:$true] %s43_s6 }
   0x9   :  { %49 = dma.hbm_to_vmem [thread:$0]  %s42_s30, 2048, %s44_s6, [#allocation6], %s273_s7, %s273_s7, %s274_s8  }
   0xa   :  { %264 = dma.done.wait [#allocation3], 128  }
   0xb   :  { %265 = vsyncadd [#allocation3], 4294967168 }
   0xc   :  { %266 = dma.done.wait [#allocation6], 2064  }
   0xd   :  { %267 = vsyncadd [#allocation6], 4294965232  ;;  %v64_v0 = vld [vmem:[#allocation2] sm:$0xff]  ;;  %v111_v4 = vld [vmem:[#allocation7 + $0x68] sm:$0xff]  ;;  %s275_s11 = smov [#allocation8]   ;;  %s146_s15 = sshll.u32 %s329_s5, 4  ;;  %s147_s15 = int_to_ptr.hbm [resolvable:$true] %s146_s15 }
   0xe   :  { %v113_v1 = vld [vmem:[#allocation7 + $0x78] sm:$0xff]  ;;  %65 = vadd.xlane.f32.xlu0 %v64_v0  ;;  %v112_v2 = vld [vmem:[#allocation7 + $0x70] sm:$0xff]  ;;  %v67_v3 = vmul.f32 %v64_v0, %v64_v0  ;;  %v110_v5 = vld [vmem:[#allocation7 + $0x60] sm:$0xff]  ;;  %s144_s12 = sshll.u32 %s275_s11, 4  ;;  %s145_s12 = int_to_ptr.vmem [resolvable:$true] %s144_s12 }
   0xf   :  { %118 = vmatpush.xpose.msra.mxu0 %v113_v1  ;;  %v109_v6 = vld [vmem:[#allocation7 + $0x58] sm:$0xff]  ;;  %v108_v7 = vld [vmem:[#allocation7 + $0x50] sm:$0xff]  ;;  %v107_v8 = vld [vmem:[#allocation7 + $0x48] sm:$0xff] }
  0x10   :  { %v106_v9 = vld [vmem:[#allocation7 + $0x40] sm:$0xff]  ;;  %v105_v10 = vld [vmem:[#allocation7 + $0x38] sm:$0xff]  ;;  %v104_v11 = vld [vmem:[#allocation7 + $0x30] sm:$0xff] }
  0x11   :  { %v103_v12 = vld [vmem:[#allocation7 + $0x28] sm:$0xff]  ;;  %v102_v13 = vld [vmem:[#allocation7 + $0x20] sm:$0xff]  ;;  %v101_v14 = vld [vmem:[#allocation7 + $0x18] sm:$0xff] }
  0x12   :  { %v100_v15 = vld [vmem:[#allocation7 + $0x10] sm:$0xff]  ;;  %v99_v16 = vld [vmem:[#allocation7 + $0x8] sm:$0xff]  ;;  %v98_v18 = vld [vmem:[#allocation7] sm:$0xff] }
  0x13   :  { %119 = vmatpush.xpose.msra.mxu0 %v112_v2  ;;  %v163_v33 = vld [vmem:[#allocation5] ss:$0 sm:$0xff]  ;;  %v164_v36 = vld [vmem:[%s326_s2] ss:$0 sm:$0xff] }
  0x14   :  { %v165_v39 = vld [vmem:[%s328_s4] ss:$0 sm:$0xff] }
  0x16   :  { %68 = vadd.xlane.f32.xlu0 %v67_v3 }
  0x17   :  { %120 = vmatpush.xpose.msra.mxu0 %v111_v4 }
  0x1b   :  { %121 = vmatpush.xpose.msra.mxu0 %v110_v5 }
  0x1f   :  { %122 = vmatpush.xpose.msra.mxu0 %v109_v6 }
  0x23   :  { %123 = vmatpush.xpose.msra.mxu0 %v108_v7 }
  0x27   :  { %124 = vmatpush.xpose.msra.mxu0 %v107_v8 }
  0x2b   :  { %125 = vmatpush.xpose.msra.mxu0 %v106_v9 }
  0x2f   :  { %126 = vmatpush.xpose.msra.mxu0 %v105_v10 }
  0x33   :  { %127 = vmatpush.xpose.msra.mxu0 %v104_v11 }
  0x37   :  { %128 = vmatpush.xpose.msra.mxu0 %v103_v12 }
  0x3b   :  { %129 = vmatpush.xpose.msra.mxu0 %v102_v13 }
  0x3f   :  { %130 = vmatpush.xpose.msra.mxu0 %v101_v14 }
  0x43   :  { %131 = vmatpush.xpose.msra.mxu0 %v100_v15 }
  0x47   :  { %132 = vmatpush.xpose.msra.mxu0 %v99_v16 }
  0x4b   :  { %133 = vmatpush.xpose.msra.mxu0 %v98_v18 }
  0x81   :  { %v66_v17 = vpop.xlane.xlu0 %65 }
  0x82   :  { %v70_v19 = vmul.f32 0.0078125, %v66_v17 }
  0x84   :  { %v72_v21 = vmul.f32 %v70_v19, %v70_v19  ;;  %v75_v32 = vsub.f32 %v64_v0, %v70_v19 }
  0x89   :  { %v69_v20 = vpop.xlane.xlu0 %68 }
  0x8a   :  { %v71_v22 = vmul.f32 0.0078125, %v69_v20 }
  0x8c   :  { %v73_v23 = vsub.f32 %v71_v22, %v72_v21 }
  0x8e   :  { %v74_v24 = vmax.f32 %v73_v23, 0.0 }
  0x90   :  { %v76_v25 = vadd.f32 1e-05, %v74_v24 }
  0x92   :  { %166 = vrsqrt.f32 %v76_v25  ;;  %vm83_vm1 = vweird.f32 %v76_v25 }
  0x98   :  { %v167_v26 = vpop.eup %166 }
  0x99   :  { %v78_v27 = vmul.f32 %v167_v26, %v76_v25  ;;  %vm84_vm0 = vweird.f32 %v167_v26 }
  0x9a   :  { %vm85_vm2 = vmor %vm83_vm1, %vm84_vm0 }
  0x9b   :  { %v79_v28 = vmul.f32 %v167_v26, %v78_v27 }
  0x9d   :  { %v80_v29 = vmul.f32 0.5, %v79_v28 }
  0x9f   :  { %v81_v30 = vsub.f32 1.5, %v80_v29 }
  0xa1   :  { %v82_v31 = vmul.f32 %v167_v26, %v81_v30 }
  0xa3   :  { %v86_v34 = vsel %vm85_vm2, %v167_v26, %v82_v31 }
  0xa4   :  { %v87_v35 = vmul.f32 %v86_v34, %v75_v32 }
  0xa6   :  { %v92_v37 = vmul.f32 %v163_v33, %v87_v35 }
  0xa8   :  { %v97_v38 = vadd.f32 %v164_v36, %v92_v37 }
  0xaa   :  { %134 = vmatmul.f32.vlgmr.msra.gmra.mxu0 %v97_v38 }
 0x127   :  { %v135_v40 = vpop.f32.mrf.mxu0 }
 0x128   :  { %v136_v41 = vadd.f32 %v165_v39, %v135_v40 }
 0x12a   :  { %138 = vst [vmem:[#allocation8] sm:$0xff] %v136_v41 }
 0x12b   :  { %149 = dma.vmem_to_hbm [thread:$0]  %s145_s12, 128, %s147_s15, [#allocation4]  }
 0x12c   :  { %268 = dma.done.wait [#allocation4], 128  }
 0x12d   :  { %269 = vsyncadd [#allocation4], 4294967168 }
 0x12e   :  { %154 = vsyncpa [#allocation3], 1 }
 0x12f   :  { %155 = vsyncpa [#allocation6], 1 }
 0x130   :  { %156 = vsyncpa [#allocation4], 1 }

</bundles_post_ra>
